<compile_context>
chip_gen: v5e
topology: v5e:2x2
jax: 0.10.0
libtpu: 0.0.40
codegen_flags: <defaults>
</compile_context>

<pallas_src>
import functools

import jax
import jax.numpy as jnp
from jax.experimental import pallas as pl
from jax.experimental.pallas import tpu as pltpu

LANE = 128
SUBLANE = 8
BITS_RANGE_LOG2 = 24  # random values live in [0, 2^24)


def _round_up(n, m):
    return (n + m - 1) // m * m


def _pad2d(a, rows, cols):
    r, c = a.shape
    return jnp.pad(a, ((0, rows - r), (0, cols - c)))


def _dropout_threshold(p):
    """int32 threshold t such that P(v >= t) == 1 - p for v ~ U[0, 2^24)."""
    return int(min(round(p * (1 << BITS_RANGE_LOG2)), (1 << BITS_RANGE_LOG2) - 1))


def _make_bits(key, shape):
    """24-bit uniform random values as int32 (safe signed compare on TPU)."""
    raw = jax.random.bits(key, shape, jnp.uint32)
    return jnp.right_shift(raw, 32 - BITS_RANGE_LOG2).astype(jnp.int32)


# ---------------------------------------------------------------------------
# Kernels
# ---------------------------------------------------------------------------
def _mlp_core(x, w1, b1, w2, b2, w3, b3, bits1, bits2, threshold, out_dtype):
    """x: (TB, IN) bf16; w*: bf16; b*: f32 (1, H); bits*: int32 or None."""
    h = jnp.dot(x, w1, preferred_element_type=jnp.float32) + b1
    h = jnp.maximum(h, 0.0)
    if bits1 is not None:
        # 1/(1-p) scale is folded into w2 -> pure select-to-zero here.
        h = jnp.where(bits1 >= threshold, h, 0.0)

    h = jnp.dot(h.astype(jnp.bfloat16), w2,
                preferred_element_type=jnp.float32) + b2
    h = jnp.maximum(h, 0.0)
    if bits2 is not None:
        h = jnp.where(bits2 >= threshold, h, 0.0)

    out = jnp.dot(h.astype(jnp.bfloat16), w3,
                  preferred_element_type=jnp.float32) + b3
    return out.astype(out_dtype)


def _mlp_kernel_train(bits1_ref, bits2_ref, x_ref, w1_ref, b1_ref, w2_ref,
                      b2_ref, w3_ref, b3_ref, o_ref, *, threshold):
    o_ref[...] = _mlp_core(x_ref[...], w1_ref[...], b1_ref[...], w2_ref[...],
                           b2_ref[...], w3_ref[...], b3_ref[...],
                           bits1_ref[...], bits2_ref[...], threshold,
                           o_ref.dtype)


def _mlp_kernel_eval(x_ref, w1_ref, b1_ref, w2_ref, b2_ref, w3_ref, b3_ref,
                     o_ref):
    o_ref[...] = _mlp_core(x_ref[...], w1_ref[...], b1_ref[...], w2_ref[...],
                           b2_ref[...], w3_ref[...], b3_ref[...],
                           None, None, 0, o_ref.dtype)


# ---------------------------------------------------------------------------
# Wrapper
# ---------------------------------------------------------------------------
def mlp_forward(x, params, key, *, dropout_prob=0.5, training=True,
                block_b=512, debug_return_bits=False):
    """x: (B, input_size) f32.  params: (w1, b1, w2, b2, w3, b3) with weights
    stored as (in_features, out_features) and biases as (1, out_features)."""
    w1, b1, w2, b2, w3, b3 = params
    B, in_size = x.shape
    h1 = w1.shape[1]
    h2 = w2.shape[1]
    out_size = w3.shape[1]

    # ---- lane-dense padding of feature dims (multiples of 128) -------------
    in_p = _round_up(in_size, LANE)
    h1_p = _round_up(h1, LANE)
    h2_p = _round_up(h2, LANE)
    out_p = _round_up(out_size, LANE)

    # ---- batch tiling -------------------------------------------------------
    tb = min(_round_up(B, SUBLANE), block_b)          # tile rows (multiple of 8)
    b_p = _round_up(B, tb)                            # padded batch
    grid = (pl.cdiv(b_p, tb),)

    use_dropout = training and dropout_prob > 0.0
    keep_scale = (1.0 / (1.0 - dropout_prob)) if use_dropout else 1.0

    # ---- one-time parameter prep: pad, fold dropout scale, cast to bf16 -----
    w1_p = _pad2d(w1, in_p, h1_p).astype(jnp.bfloat16)
    w2_p = (_pad2d(w2, h1_p, h2_p) * keep_scale).astype(jnp.bfloat16)
    w3_p = (_pad2d(w3, h2_p, out_p) * keep_scale).astype(jnp.bfloat16)
    b1_p = _pad2d(b1.reshape(1, -1).astype(jnp.float32), 1, h1_p)
    b2_p = _pad2d(b2.reshape(1, -1).astype(jnp.float32), 1, h2_p)
    b3_p = _pad2d(b3.reshape(1, -1).astype(jnp.float32), 1, out_p)

    x_p = _pad2d(x, b_p, in_p).astype(jnp.bfloat16)

    # ---- BlockSpecs ----------------------------------------------------------
    x_spec = pl.BlockSpec((tb, in_p), lambda i: (i, 0))
    o_spec = pl.BlockSpec((tb, out_p), lambda i: (i, 0))

    def const(shape):
        return pl.BlockSpec(shape, lambda i: (0, 0))   # resident across grid

    weight_specs = [const((in_p, h1_p)), const((1, h1_p)),
                    const((h1_p, h2_p)), const((1, h2_p)),
                    const((h2_p, out_p)), const((1, out_p))]

    bits1 = bits2 = None
    if use_dropout:
        threshold = _dropout_threshold(dropout_prob)
        k1, k2 = jax.random.split(key)
        bits1 = _make_bits(k1, (b_p, h1_p))
        bits2 = _make_bits(k2, (b_p, h2_p))
        kernel = functools.partial(_mlp_kernel_train, threshold=threshold)
        in_specs = [pl.BlockSpec((tb, h1_p), lambda i: (i, 0)),
                    pl.BlockSpec((tb, h2_p), lambda i: (i, 0)),
                    x_spec] + weight_specs
        args = (bits1, bits2, x_p, w1_p, b1_p, w2_p, b2_p, w3_p, b3_p)
    else:
        kernel = _mlp_kernel_eval
        in_specs = [x_spec] + weight_specs
        args = (x_p, w1_p, b1_p, w2_p, b2_p, w3_p, b3_p)

    # ---- explicit VMEM budget (headroom, safe for v7x's 64 MiB) -------------
    weight_bytes = (2 * (in_p * h1_p + h1_p * h2_p + h2_p * out_p)
                    + 4 * (h1_p + h2_p + out_p))
    tile_bytes = tb * (2 * in_p + 4 * out_p)           # bf16 x-tile, f32 o-tile
    if use_dropout:
        tile_bytes += tb * 4 * (h1_p + h2_p)           # int32 bit tiles
    inter_bytes = tb * 4 * max(h1_p, h2_p)             # f32 intermediates
    vmem_limit = int(min(max(weight_bytes + 4 * tile_bytes + 2 * inter_bytes
                             + (4 << 20), 16 << 20), 48 << 20))

    out_padded = pl.pallas_call(
        kernel,
        out_shape=jax.ShapeDtypeStruct((b_p, out_p), jnp.float32),
        grid=grid,
        in_specs=in_specs,
        out_specs=o_spec,
        compiler_params=pltpu.CompilerParams(
            dimension_semantics=("parallel",),
            vmem_limit_bytes=vmem_limit),
    )(*args)

    out = out_padded[:B, :out_size]
    if debug_return_bits:
        return out, bits1, bits2
    return out


# ---------------------------------------------------------------------------
# Param init (mimics nn.Linear's U(-1/sqrt(fan_in), 1/sqrt(fan_in)))
# ---------------------------------------------------------------------------
def init_params(key, input_size, hidden1, hidden2, output_size):
    def linear(k, fan_in, fan_out):
        kw, kb = jax.random.split(k)
        lim = 1.0 / jnp.sqrt(jnp.float32(fan_in))
        w = jax.random.uniform(kw, (fan_in, fan_out), jnp.float32, -lim, lim)
        b = jax.random.uniform(kb, (1, fan_out), jnp.float32, -lim, lim)
        return w, b

    k1, k2, k3 = jax.random.split(key, 3)
    w1, b1 = linear(k1, input_size, hidden1)
    w2, b2 = linear(k2, hidden1, hidden2)
    w3, b3 = linear(k3, hidden2, output_size)
    return w1, b1, w2, b2, w3, b3


# ---------------------------------------------------------------------------
# Pure-JAX reference (same bf16/f32-acc numerics as the kernel)
# ---------------------------------------------------------------------------
def _ref_forward(x, params, dropout_prob, bits1=None, bits2=None, thr=0):
    w1, b1, w2, b2, w3, b3 = params
    use_dropout = bits1 is not None
    scale = (1.0 / (1.0 - dropout_prob)) if use_dropout else 1.0
    bf = jnp.bfloat16

    h = jnp.dot(x.astype(bf), w1.astype(bf),
                preferred_element_type=jnp.float32) + b1
    h = jnp.maximum(h, 0.0)
    if use_dropout:
        h = jnp.where(bits1 >= thr, h, 0.0)

    h = jnp.dot(h.astype(bf), (w2 * scale).astype(bf),
                preferred_element_type=jnp.float32) + b2
    h = jnp.maximum(h, 0.0)
    if use_dropout:
        h = jnp.where(bits2 >= thr, h, 0.0)

    return jnp.dot(h.astype(bf), (w3 * scale).astype(bf),
                   preferred_element_type=jnp.float32) + b3


if __name__ == "__main__":
    key = jax.random.PRNGKey(0)
    kx, kp, kd = jax.random.split(key, 3)

    B, input_size, hidden1, hidden2, output_size = 8, 32, 64, 64, 16
    dropout_prob = 0.5

    x = jax.random.normal(kx, (B, input_size), jnp.float32)
    params = init_params(kp, input_size, hidden1, hidden2, output_size)

    # ---- Training mode (dropout active): exact-mask reference check ---------
    out_train, bits1, bits2 = mlp_forward(
        x, params, kd, dropout_prob=dropout_prob, training=True,
        debug_return_bits=True)
    out_train = jax.block_until_ready(out_train)
    assert out_train.shape == (B, output_size), out_train.shape
    assert bool(jnp.all(jnp.isfinite(out_train)))

    thr = _dropout_threshold(dropout_prob)
    ref_train = _ref_forward(x, params, dropout_prob,
                             bits1[:B, :hidden1], bits2[:B, :hidden2], thr)
    assert jnp.allclose(out_train, ref_train, atol=2e-2, rtol=2e-2), (
        float(jnp.max(jnp.abs(out_train - ref_train))))

    # ---- Eval mode (dropout off): reference check ----------------------------
    out_eval = jax.block_until_ready(
        mlp_forward(x, params, kd, dropout_prob=dropout_prob, training=False))
    ref_eval = _ref_forward(x, params, dropout_prob)
    assert out_eval.shape == ref_eval.shape
    assert jnp.allclose(out_eval, ref_eval, atol=2e-2, rtol=2e-2), (
        float(jnp.max(jnp.abs(out_eval - ref_eval))))

    print("KERNEL_OK")
</pallas_src>

<mosaic_0001>
module attributes {stable_mosaic.version = 11 : i64} {
  func.func @_mlp_kernel_train(%arg0: i32, %arg1: memref<8x128xi32, #tpu.memory_space<vmem>>, %arg2: memref<8x128xi32, #tpu.memory_space<vmem>>, %arg3: memref<8x128xbf16, #tpu.memory_space<vmem>>, %arg4: memref<128x128xbf16, #tpu.memory_space<vmem>>, %arg5: memref<1x128xf32, #tpu.memory_space<vmem>>, %arg6: memref<128x128xbf16, #tpu.memory_space<vmem>>, %arg7: memref<1x128xf32, #tpu.memory_space<vmem>>, %arg8: memref<128x128xbf16, #tpu.memory_space<vmem>>, %arg9: memref<1x128xf32, #tpu.memory_space<vmem>>, %arg10: memref<8x128xf32, #tpu.memory_space<vmem>>) attributes {dimension_semantics = [#tpu.dimension_semantics<parallel>], iteration_bounds = array<i64: 1>, scalar_prefetch = 0 : i64, scratch_operands = 0 : i64, tpu.core_type = #tpu.core_type<tc>, window_params = [{transform_indices = @transform_0, window_bounds = array<i64: 8, 128>}, {transform_indices = @transform_1, window_bounds = array<i64: 8, 128>}, {transform_indices = @transform_2, window_bounds = array<i64: 8, 128>}, {pipeline_mode = #tpu.pipeline_mode<synchronous>, transform_indices = @transform_3, window_bounds = array<i64: 128, 128>}, {pipeline_mode = #tpu.pipeline_mode<synchronous>, transform_indices = @transform_4, window_bounds = array<i64: 1, 128>}, {pipeline_mode = #tpu.pipeline_mode<synchronous>, transform_indices = @transform_5, window_bounds = array<i64: 128, 128>}, {pipeline_mode = #tpu.pipeline_mode<synchronous>, transform_indices = @transform_6, window_bounds = array<i64: 1, 128>}, {pipeline_mode = #tpu.pipeline_mode<synchronous>, transform_indices = @transform_7, window_bounds = array<i64: 128, 128>}, {pipeline_mode = #tpu.pipeline_mode<synchronous>, transform_indices = @transform_8, window_bounds = array<i64: 1, 128>}, {transform_indices = @transform_9, window_bounds = array<i64: 8, 128>}]} {
    %c0 = arith.constant 0 : index
    %c0_0 = arith.constant 0 : index
    %0 = vector.load %arg3[%c0, %c0_0] : memref<8x128xbf16, #tpu.memory_space<vmem>>, vector<8x128xbf16>
    %c0_1 = arith.constant 0 : index
    %c0_2 = arith.constant 0 : index
    %1 = vector.load %arg4[%c0_1, %c0_2] : memref<128x128xbf16, #tpu.memory_space<vmem>>, vector<128x128xbf16>
    %c0_3 = arith.constant 0 : index
    %c0_4 = arith.constant 0 : index
    %2 = vector.load %arg5[%c0_3, %c0_4] : memref<1x128xf32, #tpu.memory_space<vmem>>, vector<1x128xf32>
    %c0_5 = arith.constant 0 : index
    %c0_6 = arith.constant 0 : index
    %3 = vector.load %arg6[%c0_5, %c0_6] : memref<128x128xbf16, #tpu.memory_space<vmem>>, vector<128x128xbf16>
    %c0_7 = arith.constant 0 : index
    %c0_8 = arith.constant 0 : index
    %4 = vector.load %arg7[%c0_7, %c0_8] : memref<1x128xf32, #tpu.memory_space<vmem>>, vector<1x128xf32>
    %c0_9 = arith.constant 0 : index
    %c0_10 = arith.constant 0 : index
    %5 = vector.load %arg8[%c0_9, %c0_10] : memref<128x128xbf16, #tpu.memory_space<vmem>>, vector<128x128xbf16>
    %c0_11 = arith.constant 0 : index
    %c0_12 = arith.constant 0 : index
    %6 = vector.load %arg9[%c0_11, %c0_12] : memref<1x128xf32, #tpu.memory_space<vmem>>, vector<1x128xf32>
    %c0_13 = arith.constant 0 : index
    %c0_14 = arith.constant 0 : index
    %7 = vector.load %arg1[%c0_13, %c0_14] : memref<8x128xi32, #tpu.memory_space<vmem>>, vector<8x128xi32>
    %c0_15 = arith.constant 0 : index
    %c0_16 = arith.constant 0 : index
    %8 = vector.load %arg2[%c0_15, %c0_16] : memref<8x128xi32, #tpu.memory_space<vmem>>, vector<8x128xi32>
    %cst = arith.constant dense<0.000000e+00> : vector<8x128xf32>
    %9 = tpu.matmul %0, %1, %cst {dimension_numbers = #tpu.dot_dimension_numbers<[1], [0], [0], [1], [0, 0, 1, 1], [], []>} : vector<8x128xbf16>, vector<128x128xbf16>, vector<8x128xf32> -> vector<8x128xf32>
    %10 = vector.broadcast %2 : vector<1x128xf32> to vector<8x128xf32>
    %11 = arith.addf %9, %10 : vector<8x128xf32>
    %cst_17 = arith.constant 0.000000e+00 : f32
    %12 = vector.broadcast %cst_17 : f32 to vector<8x128xf32>
    %13 = arith.maximumf %11, %12 : vector<8x128xf32>
    %c8388608_i32 = arith.constant 8388608 : i32
    %14 = vector.broadcast %c8388608_i32 : i32 to vector<8x128xi32>
    %15 = arith.cmpi sge, %7, %14 : vector<8x128xi32>
    %cst_18 = arith.constant 0.000000e+00 : f32
    %16 = vector.broadcast %cst_18 : f32 to vector<8x128xf32>
    %17 = arith.select %15, %13, %16 : vector<8x128xi1>, vector<8x128xf32>
    %18 = arith.truncf %17 : vector<8x128xf32> to vector<8x128xbf16>
    %cst_19 = arith.constant dense<0.000000e+00> : vector<8x128xf32>
    %19 = tpu.matmul %18, %3, %cst_19 {dimension_numbers = #tpu.dot_dimension_numbers<[1], [0], [0], [1], [0, 0, 1, 1], [], []>} : vector<8x128xbf16>, vector<128x128xbf16>, vector<8x128xf32> -> vector<8x128xf32>
    %20 = vector.broadcast %4 : vector<1x128xf32> to vector<8x128xf32>
    %21 = arith.addf %19, %20 : vector<8x128xf32>
    %cst_20 = arith.constant 0.000000e+00 : f32
    %22 = vector.broadcast %cst_20 : f32 to vector<8x128xf32>
    %23 = arith.maximumf %21, %22 : vector<8x128xf32>
    %c8388608_i32_21 = arith.constant 8388608 : i32
    %24 = vector.broadcast %c8388608_i32_21 : i32 to vector<8x128xi32>
    %25 = arith.cmpi sge, %8, %24 : vector<8x128xi32>
    %cst_22 = arith.constant 0.000000e+00 : f32
    %26 = vector.broadcast %cst_22 : f32 to vector<8x128xf32>
    %27 = arith.select %25, %23, %26 : vector<8x128xi1>, vector<8x128xf32>
    %28 = arith.truncf %27 : vector<8x128xf32> to vector<8x128xbf16>
    %cst_23 = arith.constant dense<0.000000e+00> : vector<8x128xf32>
    %29 = tpu.matmul %28, %5, %cst_23 {dimension_numbers = #tpu.dot_dimension_numbers<[1], [0], [0], [1], [0, 0, 1, 1], [], []>} : vector<8x128xbf16>, vector<128x128xbf16>, vector<8x128xf32> -> vector<8x128xf32>
    %30 = vector.broadcast %6 : vector<1x128xf32> to vector<8x128xf32>
    %31 = arith.addf %29, %30 : vector<8x128xf32>
    %c0_24 = arith.constant 0 : index
    %c0_25 = arith.constant 0 : index
    %32 = vector.load %arg10[%c0_24, %c0_25] : memref<8x128xf32, #tpu.memory_space<vmem>>, vector<8x128xf32>
    tpu.vector_store %arg10[%c0_24, %c0_25], %31 {strides = array<i32>} : memref<8x128xf32, #tpu.memory_space<vmem>>, vector<8x128xf32>,
    return
  }
  func.func @transform_0(%arg0: i32) -> (i32, i32) {
    %c0_i32 = arith.constant 0 : i32
    %c0_i32_0 = arith.constant 0 : i32
    return %arg0, %c0_i32 : i32, i32
  }
  func.func @transform_1(%arg0: i32) -> (i32, i32) {
    %c0_i32 = arith.constant 0 : i32
    %c0_i32_0 = arith.constant 0 : i32
    return %arg0, %c0_i32 : i32, i32
  }
  func.func @transform_2(%arg0: i32) -> (i32, i32) {
    %c0_i32 = arith.constant 0 : i32
    %c0_i32_0 = arith.constant 0 : i32
    return %arg0, %c0_i32 : i32, i32
  }
  func.func @transform_3(%arg0: i32) -> (i32, i32) {
    %c0_i32 = arith.constant 0 : i32
    %c0_i32_0 = arith.constant 0 : i32
    %c0_i32_1 = arith.constant 0 : i32
    return %c0_i32, %c0_i32_0 : i32, i32
  }
  func.func @transform_4(%arg0: i32) -> (i32, i32) {
    %c0_i32 = arith.constant 0 : i32
    %c0_i32_0 = arith.constant 0 : i32
    %c0_i32_1 = arith.constant 0 : i32
    return %c0_i32, %c0_i32_0 : i32, i32
  }
  func.func @transform_5(%arg0: i32) -> (i32, i32) {
    %c0_i32 = arith.constant 0 : i32
    %c0_i32_0 = arith.constant 0 : i32
    %c0_i32_1 = arith.constant 0 : i32
    return %c0_i32, %c0_i32_0 : i32, i32
  }
  func.func @transform_6(%arg0: i32) -> (i32, i32) {
    %c0_i32 = arith.constant 0 : i32
    %c0_i32_0 = arith.constant 0 : i32
    %c0_i32_1 = arith.constant 0 : i32
    return %c0_i32, %c0_i32_0 : i32, i32
  }
  func.func @transform_7(%arg0: i32) -> (i32, i32) {
    %c0_i32 = arith.constant 0 : i32
    %c0_i32_0 = arith.constant 0 : i32
    %c0_i32_1 = arith.constant 0 : i32
    return %c0_i32, %c0_i32_0 : i32, i32
  }
  func.func @transform_8(%arg0: i32) -> (i32, i32) {
    %c0_i32 = arith.constant 0 : i32
    %c0_i32_0 = arith.constant 0 : i32
    %c0_i32_1 = arith.constant 0 : i32
    return %c0_i32, %c0_i32_0 : i32, i32
  }
  func.func @transform_9(%arg0: i32) -> (i32, i32) {
    %c0_i32 = arith.constant 0 : i32
    %c0_i32_0 = arith.constant 0 : i32
    return %arg0, %c0_i32 : i32, i32
  }
}

</mosaic_0001>

<bundles_post_ra>
// kernel: tpu_custom_call.1
= control target key start
LH: loop header
LB: loop body
LE: loop exit
PB: predicated region body
PF: predicated region fallthrough
CT: control target
= control target key end

     0   :  { %14 = vsyncpa [#allocation3], 0  ;;  %s801_s0 = inlined_call_operand.hbm [shape: s32[8,128], index: 0, kind: input, shape index: {}]   ;;  %s802_s1 = inlined_call_operand.hbm [shape: s32[8,128], index: 1, kind: input, shape index: {}]   ;;  %s803_s2 = inlined_call_operand.hbm [shape: bf16[8,128], index: 2, kind: input, shape index: {}]   ;;  %s804_s3 = inlined_call_operand.hbm [shape: bf16[128,128], index: 3, kind: input, shape index: {}]   ;;  %s805_s4 = inlined_call_operand.vmem [shape: f32[1,128], index: 4, kind: input, shape index: {}]   ;;  %s806_s5 = inlined_call_operand.hbm [shape: bf16[128,128], index: 5, kind: input, shape index: {}]   ;;  %s807_s6 = inlined_call_operand.vmem [shape: f32[1,128], index: 6, kind: input, shape index: {}]   ;;  %s808_s7 = inlined_call_operand.hbm [shape: bf16[128,128], index: 7, kind: input, shape index: {}]   ;;  %s809_s8 = inlined_call_operand.vmem [shape: f32[1,128], index: 8, kind: input, shape index: {}]   ;;  %s810_s9 = inlined_call_operand.hbm [shape: f32[8,128], index: 9, kind: output, shape index: {}]  }
   0x1   :  { %15 = vsyncpa [#allocation6], 0 }
   0x2   :  { %16 = vsyncpa [#allocation9], 0 }
   0x3   :  { %17 = vsyncpa [#allocation12], 0  ;;  %s35_s11 = sshll.u32 %s802_s1, 4  ;;  %s36_s11 = int_to_ptr.hbm [resolvable:$true] %s35_s11 }
   0x4   :  { %18 = vsyncpa [#allocation4], 0  ;;  %s712_s12 = smov [#allocation5]   ;;  %s56_s16 = sshll.u32 %s804_s3, 4  ;;  %s57_s16 = int_to_ptr.hbm [resolvable:$true] %s56_s16 }
   0x5   :  { %s37_s13 = sshll.u32 %s712_s12, 4  ;;  %s713_s17 = smov [#allocation8]   ;;  %s38_s13 = int_to_ptr.vmem [resolvable:$true] %s37_s13 }
   0x6   :  { %40 = dma.hbm_to_vmem [thread:$0]  %s36_s11, 128, %s38_s13, [#allocation6]  }
   0x7   :  { %s58_s18 = sshll.u32 %s713_s17, 4  ;;  %s714_s19 = smov 64   ;;  %s59_s18 = int_to_ptr.vmem [resolvable:$true] %s58_s18 }
   0x8   :  { %s715_s20 = smov 4   ;;  %s24_s1 = sshll.u32 %s801_s0, 4  ;;  %s25_s1 = int_to_ptr.hbm [resolvable:$true] %s24_s1 }
   0x9   :  { %64 = dma.hbm_to_vmem [thread:$0]  %s57_s16, 1024, %s59_s18, [#allocation9], %s714_s19, %s714_s19, %s715_s20  }
   0xa   :  { %s716_s23 = smov [#allocation2]   ;;  %s46_s3 = sshll.u32 %s803_s2, 4  ;;  %s47_s3 = int_to_ptr.hbm [resolvable:$true] %s46_s3 }
   0xb   :  { %s26_s24 = sshll.u32 %s716_s23, 4  ;;  %s717_s27 = smov [#allocation7]   ;;  %s27_s24 = int_to_ptr.vmem [resolvable:$true] %s26_s24 }
   0xc   :  { %29 = dma.hbm_to_vmem [thread:$0]  %s25_s1, 128, %s27_s24, [#allocation3]  }
   0xd   :  { %s48_s28 = sshll.u32 %s717_s27, 4  ;;  %s71_s10 = sshll.u32 %s806_s5, 4  ;;  %s49_s28 = int_to_ptr.vmem [resolvable:$true] %s48_s28  ;;  %s72_s10 = int_to_ptr.hbm [resolvable:$true] %s71_s10 }
   0xe   :  { %51 = dma.hbm_to_vmem [thread:$0]  %s47_s3, 64, %s49_s28, [#allocation6]  }
   0xf   :  { %s86_s12 = sshll.u32 %s808_s7, 4  ;;  %s718_s13 = smov [#allocation10]   ;;  %s87_s12 = int_to_ptr.hbm [resolvable:$true] %s86_s12 }
  0x10   :  { %s73_s14 = sshll.u32 %s718_s13, 4  ;;  %s719_s2 = smov [#allocation11]   ;;  %s74_s14 = int_to_ptr.vmem [resolvable:$true] %s73_s14 }
  0x11   :  { %79 = dma.hbm_to_vmem [thread:$0]  %s72_s10, 1024, %s74_s14, [#allocation9], %s714_s19, %s714_s19, %s715_s20  }
  0x12   :  { %s88_s15 = sshll.u32 %s719_s2, 4  ;;  %s89_s15 = int_to_ptr.vmem [resolvable:$true] %s88_s15 }
  0x13   :  { %94 = dma.hbm_to_vmem [thread:$0]  %s87_s12, 1024, %s89_s15, [#allocation12], %s714_s19, %s714_s19, %s715_s20  }
  0x14   :  { %702 = dma.done.wait [#allocation3], 128  }
  0x15   :  { %703 = vsyncadd [#allocation3], 4294967168 }
  0x16   :  { %704 = dma.done.wait [#allocation6], 192  }
  0x17   :  { %705 = vsyncadd [#allocation6], 4294967104 }
  0x18   :  { %706 = dma.done.wait [#allocation9], 2048  }
  0x19   :  { %707 = vsyncadd [#allocation9], 4294965248 }
  0x1a   :  { %708 = dma.done.wait [#allocation12], 1024  }
  0x1b   :  { %709 = vsyncadd [#allocation12], 4294966272  ;;  %v505_v0 = vld [vmem:[#allocation8 + $0x38] sm:$0xff]  ;;  %v504_v1 = vld [vmem:[#allocation8 + $0x30] sm:$0xff]  ;;  %s720_s19 = smov [#allocation13]   ;;  %s383_s1 = sshll.u32 %s810_s9, 4  ;;  %s384_s1 = int_to_ptr.hbm [resolvable:$true] %s383_s1 }
  0x1c   :  { %226 = vmatpush.bf16.msra.mxu0 %v505_v0  ;;  %v513_v2 = vld [vmem:[#allocation10 + $0x38] sm:$0xff]  ;;  %v512_v3 = vld [vmem:[#allocation10 + $0x30] sm:$0xff]  ;;  %v503_v4 = vld [vmem:[#allocation8 + $0x28] sm:$0xff]  ;;  %s381_s20 = sshll.u32 %s720_s19, 4  ;;  %s382_s20 = int_to_ptr.vmem [resolvable:$true] %s381_s20 }
  0x1d   :  { %294 = vmatpush.bf16.msra.mxu1 %v513_v2  ;;  %v511_v5 = vld [vmem:[#allocation10 + $0x28] sm:$0xff]  ;;  %v502_v6 = vld [vmem:[#allocation8 + $0x20] sm:$0xff]  ;;  %v501_v8 = vld [vmem:[#allocation8 + $0x18] sm:$0xff] }
  0x1e   :  { %v510_v7 = vld [vmem:[#allocation10 + $0x20] sm:$0xff]  ;;  %v509_v9 = vld [vmem:[#allocation10 + $0x18] sm:$0xff]  ;;  %v500_v10 = vld [vmem:[#allocation8 + $0x10] sm:$0xff] }
  0x1f   :  { %v508_v11 = vld [vmem:[#allocation10 + $0x10] sm:$0xff]  ;;  %v499_v12 = vld [vmem:[#allocation8 + $0x8] sm:$0xff]  ;;  %v498_v13 = vld [vmem:[#allocation8] sm:$0xff] }
  0x20   :  { %227 = vmatpush.bf16.msra.mxu0 %v504_v1  ;;  %v121_v14 = vld [vmem:[#allocation7] sm:$0xf]  ;;  %v507_v15 = vld [vmem:[#allocation10 + $0x8] sm:$0xff]  ;;  %v506_v16 = vld [vmem:[#allocation10] sm:$0xff] }
  0x21   :  { %295 = vmatpush.bf16.msra.mxu1 %v512_v3  ;;  %v521_v17 = vld [vmem:[#allocation11 + $0x38] sm:$0xff]  ;;  %v520_v18 = vld [vmem:[#allocation11 + $0x30] sm:$0xff]  ;;  %v519_v19 = vld [vmem:[#allocation11 + $0x28] sm:$0xff] }
  0x22   :  { %362 = vmatpush.bf16.msra.mxu2 %v521_v17  ;;  %v518_v20 = vld [vmem:[#allocation11 + $0x20] sm:$0xff]  ;;  %v517_v21 = vld [vmem:[#allocation11 + $0x18] sm:$0xff]  ;;  %v516_v22 = vld [vmem:[#allocation11 + $0x10] sm:$0xff] }
  0x23   :  { %v531_v23 = vld [vmem:[%s805_s4] ss:$0 sm:$0xff]  ;;  %v514_v31 = vld [vmem:[#allocation11] sm:$0xff]  ;;  %v174_v33 = vld [vmem:[#allocation5] sm:$0xff] }
  0x24   :  { %228 = vmatpush.bf16.msra.mxu0 %v503_v4  ;;  %v173_v24 = vld [vmem:[#allocation2] sm:$0xff]  ;;  %vm308_vm2 = vcmp.ge.s32.totalorder %v174_v33, 8388608 }
  0x25   :  { %296 = vmatpush.bf16.msra.mxu1 %v511_v5  ;;  %vm240_vm0 = vcmp.ge.s32.totalorder %v173_v24, 8388608  ;;  %v515_v30 = vld [vmem:[#allocation11 + $0x8] sm:$0xff]  ;;  %vm495_vm3 = vmpackc.low %vm308_vm2, %vm308_vm2 }
  0x26   :  { %363 = vmatpush.bf16.msra.mxu2 %v520_v18  ;;  %vm460_vm1 = vmpackc.low %vm240_vm0, %vm240_vm0  ;;  %v532_v32 = vld [vmem:[%s807_s6] ss:$0 sm:$0xff] }
  0x27   :  { %v533_v39 = vld [vmem:[%s809_s8] ss:$0 sm:$0xff] }
  0x28   :  { %229 = vmatpush.bf16.msra.mxu0 %v502_v6 }
  0x29   :  { %297 = vmatpush.bf16.msra.mxu1 %v510_v7 }
  0x2a   :  { %364 = vmatpush.bf16.msra.mxu2 %v519_v19 }
  0x2c   :  { %230 = vmatpush.bf16.msra.mxu0 %v501_v8 }
  0x2d   :  { %298 = vmatpush.bf16.msra.mxu1 %v509_v9 }
  0x2e   :  { %365 = vmatpush.bf16.msra.mxu2 %v518_v20 }
  0x30   :  { %231 = vmatpush.bf16.msra.mxu0 %v500_v10 }
  0x31   :  { %299 = vmatpush.bf16.msra.mxu1 %v508_v11 }
  0x32   :  { %366 = vmatpush.bf16.msra.mxu2 %v517_v21 }
  0x34   :  { %232 = vmatpush.bf16.msra.mxu0 %v499_v12 }
  0x35   :  { %300 = vmatpush.bf16.msra.mxu1 %v507_v15 }
  0x36   :  { %367 = vmatpush.bf16.msra.mxu2 %v516_v22 }
  0x38   :  { %233 = vmatpush.bf16.msra.mxu0 %v498_v13 }
  0x39   :  { %301 = vmatpush.bf16.msra.mxu1 %v506_v16 }
  0x3a   :  { %368 = vmatpush.bf16.msra.mxu2 %v515_v30 }
  0x3b   :  { %234 = vmatmul.bf16.vlgmr.msra.gmra.mxu0 %v121_v14 }
  0x3e   :  { %369 = vmatpush.bf16.msra.mxu2 %v514_v31 }
  0xb8   :  { %v235_v25 = vpop.f32.mrf.mxu0 }
  0xb9   :  { %v236_v26 = vadd.f32 %v531_v23, %v235_v25 }
  0xbb   :  { %v239_v27 = vmax.f32 %v236_v26, 0.0 }
  0xbd   :  { %v461_v28 = vpack.c.bf16 %v239_v27, %v239_v27 }
  0xbf   :  { %462 = vmatmul.msk.bf16.vlgmr.msra.gmra.mxu1 %vm460_vm1, %v461_v28 }
  0xc0   :  { %v237_v29 = vpop.f32.mrf.mxu0 }
 0x13c   :  { %v303_v34 = vpop.f32.mrf.mxu1 }
 0x13d   :  { %v304_v35 = vadd.f32 %v532_v32, %v303_v34 }
 0x13f   :  { %v307_v36 = vmax.f32 %v304_v35, 0.0 }
 0x141   :  { %v496_v37 = vpack.c.bf16 %v307_v36, %v307_v36 }
 0x143   :  { %497 = vmatmul.msk.bf16.vlgmr.msra.gmra.mxu2 %vm495_vm3, %v496_v37 }
 0x144   :  { %v305_v38 = vpop.f32.mrf.mxu1 }
 0x1c6   :  { %v371_v40 = vpop.f32.mrf.mxu2 }
 0x1c7   :  { %v372_v41 = vadd.f32 %v533_v39, %v371_v40 }
 0x1c9   :  { %375 = vst [vmem:[#allocation13] sm:$0xff] %v372_v41 }
 0x1ca   :  { %386 = dma.vmem_to_hbm [thread:$0]  %s382_s20, 128, %s384_s1, [#allocation4]  }
 0x1ce   :  { %v373_v42 = vpop.f32.mrf.mxu2 }
 0x1cf   :  { %710 = dma.done.wait [#allocation4], 128  }
 0x1d0   :  { %711 = vsyncadd [#allocation4], 4294967168 }
 0x1d1   :  { %391 = vsyncpa [#allocation3], 1 }
 0x1d2   :  { %392 = vsyncpa [#allocation6], 1 }
 0x1d3   :  { %393 = vsyncpa [#allocation9], 1 }
 0x1d4   :  { %394 = vsyncpa [#allocation12], 1 }
 0x1d5   :  { %395 = vsyncpa [#allocation4], 1 }

</bundles_post_ra>
